<compile_context>
chip_gen: v7x
topology: tpu7x:2x2x1
jax: 0.10.0
libtpu: 0.0.40
codegen_flags: <defaults>
</compile_context>

<pallas_src>
import jax
import jax.numpy as jnp
from jax.experimental import pallas as pl
from jax.experimental.pallas import tpu as pltpu

LANE = 128     # last block dim padded to a multiple of this (lane-dense stores)
SUBLANE = 8    # batch tile must be a multiple of this


def _round_up(x: int, m: int) -> int:
    return (x + m - 1) // m * m


def _cdiv(a: int, b: int) -> int:
    return -(-a // b)


# ----------------------------------------------------------------------------
# Kernel
# ----------------------------------------------------------------------------
def _make_fc_block_kernel(n_layers: int):
    """Fused multi-layer kernel: acc = relu(h @ W_l + b_l), h = bf16(acc).

    refs = (x_ref, w_0, b_0, w_1, b_1, ..., o_ref)
      x_ref : (TM, K0p)  VMEM  bf16
      w_l   : (Klp, Nlp) VMEM  bf16  (zero-padded -> padded lanes stay inert)
      b_l   : (1,  Nlp)  VMEM  f32   (zero-padded)
      o_ref : (TM, NLp)  VMEM  out dtype
    """
    def kernel(*refs):
        x_ref = refs[0]
        o_ref = refs[-1]
        wb = refs[1:-1]

        h = x_ref[...]                       # bf16 activation tile
        acc = None
        # Static Python unroll over layers — activation never touches HBM.
        for l in range(n_layers):
            w = wb[2 * l][...]               # bf16 (Klp, Nlp)
            b = wb[2 * l + 1][...]           # f32  (1,  Nlp)
            # bf16 x bf16 -> f32 accumulation on the MXU.
            acc = jnp.dot(h, w, preferred_element_type=jnp.float32)
            # Bias + ReLU epilogue in f32 (VPU f32 path works on all chips).
            acc = jnp.maximum(acc + b, 0.0)
            if l + 1 < n_layers:
                h = acc.astype(jnp.bfloat16)  # feed next MXU in native dtype
        o_ref[...] = acc.astype(o_ref.dtype)

    return kernel


# ----------------------------------------------------------------------------
# One-time parameter preparation (padding + bf16 cast hoisted out of forward)
# ----------------------------------------------------------------------------
def prepare_fc_block_params(params, in_dim: int):
    """Pad weights/biases to lane-dense widths ONCE, weights in bf16.

    params: list of (w, b) with w of shape (n_in, n_out) (== torch weight.T)
            and b of shape (n_out,).
    """
    widths = [in_dim] + [w.shape[1] for (w, _) in params]
    padded = [_round_up(d, LANE) for d in widths]
    wb = []
    for li, (w, b) in enumerate(params):
        kp, np_ = padded[li], padded[li + 1]
        wp = (jnp.zeros((kp, np_), jnp.bfloat16)
              .at[: w.shape[0], : w.shape[1]].set(w.astype(jnp.bfloat16)))
        bp = (jnp.zeros((1, np_), jnp.float32)
              .at[0, : b.shape[0]].set(b.astype(jnp.float32)))
        wb.append((wp, bp))
    return {"wb": tuple(wb), "widths": tuple(widths), "padded": tuple(padded)}


# ----------------------------------------------------------------------------
# Batch tiling + VMEM budget
# ----------------------------------------------------------------------------
def _pick_batch_tiling(M: int, tm_max: int = 512):
    """Choose (tm, m_pad, n_tiles) minimizing dead-row padding; ensure >=2 grid
    steps for M >= 16 so the parallel axis can use both v7x TensorCores."""
    n_tiles = max(1, _cdiv(M, tm_max))
    if n_tiles == 1 and M >= 16:
        n_tiles = 2
    tm = _round_up(_cdiv(M, n_tiles), SUBLANE)
    m_pad = tm * n_tiles
    return tm, m_pad, n_tiles


def _vmem_limit_bytes(tm: int, padded, n_layers: int, out_itemsize: int) -> int:
    bf2, f4 = 2, 4
    x_bytes = 2 * tm * padded[0] * bf2                      # x: 2 bufs, bf16
    out_bytes = 2 * tm * padded[-1] * out_itemsize          # out: 2 bufs
    w_bytes = sum(padded[l] * padded[l + 1] * bf2 for l in range(n_layers))
    b_bytes = sum(padded[l + 1] * f4 for l in range(n_layers))
    h_bytes = tm * max(padded[1:]) * (f4 + bf2)             # live f32 + bf16 act
    need = x_bytes + out_bytes + w_bytes + b_bytes + h_bytes
    try:
        phys = pltpu.get_tpu_info().vmem_capacity_bytes     # per-core VMEM
    except Exception:
        phys = 64 << 20                                     # safe on v5e/v6e/v7x
    limit = int(need * 1.3) + (4 << 20)                     # headroom
    limit = min(limit, int(phys * 0.9))
    limit = max(limit, 16 << 20)
    return limit


# ----------------------------------------------------------------------------
# Forward
# ----------------------------------------------------------------------------
def fc_block_forward(x: jax.Array, prepared, *, tm_max: int = 512) -> jax.Array:
    """FCBlock forward as a single fused Pallas call.

    x: (batch, in_dim).  `prepared` comes from prepare_fc_block_params.
    """
    M, K0 = x.shape
    widths = prepared["widths"]
    padded = prepared["padded"]
    wb = prepared["wb"]
    n_layers = len(wb)
    assert K0 == widths[0]

    tm, m_pad, _ = _pick_batch_tiling(M, tm_max)

    # Pad/cast x only when needed (skip entirely if already aligned).
    if M == m_pad and K0 == padded[0]:
        xp = x.astype(jnp.bfloat16)
    else:
        xp = (jnp.zeros((m_pad, padded[0]), jnp.bfloat16)
              .at[:M, :K0].set(x.astype(jnp.bfloat16)))

    grid = (m_pad // tm,)

    # BlockSpecs.  Weight/bias index_maps are constant -> single-buffer them.
    in_specs = [pl.BlockSpec((tm, padded[0]), lambda i: (i, 0))]
    flat_wb = []
    for li in range(n_layers):
        kp, np_ = padded[li], padded[li + 1]
        in_specs.append(pl.BlockSpec((kp, np_), lambda i: (0, 0),
                                     pipeline_mode=pl.Buffered(1)))
        in_specs.append(pl.BlockSpec((1, np_), lambda i: (0, 0),
                                     pipeline_mode=pl.Buffered(1)))
        flat_wb += [wb[li][0], wb[li][1]]
    out_specs = pl.BlockSpec((tm, padded[-1]), lambda i: (i, 0))

    out_dtype = x.dtype
    vmem_limit = _vmem_limit_bytes(tm, padded, n_layers,
                                   jnp.dtype(out_dtype).itemsize)

    flops = sum(2 * m_pad * padded[l] * padded[l + 1] for l in range(n_layers))
    bytes_accessed = (
        m_pad * padded[0] * 2                                       # x (bf16)
        + sum(padded[l] * padded[l + 1] * 2 + padded[l + 1] * 4
              for l in range(n_layers))                             # W bf16, b f32
        + m_pad * padded[-1] * jnp.dtype(out_dtype).itemsize        # out
    )

    out = pl.pallas_call(
        _make_fc_block_kernel(n_layers),
        out_shape=jax.ShapeDtypeStruct((m_pad, padded[-1]), out_dtype),
        grid=grid,
        in_specs=in_specs,
        out_specs=out_specs,
        compiler_params=pltpu.CompilerParams(
            dimension_semantics=("parallel",),   # batch axis -> megacore shard
            vmem_limit_bytes=vmem_limit,
        ),
        cost_estimate=pl.CostEstimate(
            flops=flops, transcendentals=0, bytes_accessed=bytes_accessed
        ),
    )(xp, *flat_wb)

    # Strip batch and lane padding.
    return out[:M, : widths[-1]]


# ----------------------------------------------------------------------------
# Parameter init mimicking torch.nn.Linear defaults
# ----------------------------------------------------------------------------
def init_fc_block_params(key, layers):
    params = []
    for n_in, n_out in zip(layers[:-1], layers[1:]):
        key, kw, kb = jax.random.split(key, 3)
        bound = 1.0 / jnp.sqrt(jnp.float32(n_in))
        # stored as (n_in, n_out) == torch weight (n_out, n_in) transposed
        w = jax.random.uniform(kw, (n_in, n_out), jnp.float32, -bound, bound)
        b = jax.random.uniform(kb, (n_out,), jnp.float32, -bound, bound)
        params.append((w, b))
    return params


if __name__ == "__main__":
    key = jax.random.PRNGKey(0)

    layers = (32, 64, 16)      # FCBlock(layers=[32, 64, 16])
    batch = 8

    key, kx = jax.random.split(key)
    x = jax.random.normal(kx, (batch, layers[0]), jnp.float32)

    params = init_fc_block_params(key, layers)
    prepared = prepare_fc_block_params(params, layers[0])   # one-time prep

    out = jax.block_until_ready(fc_block_forward(x, prepared))
    assert out.shape == (batch, layers[-1])

    # Reference 1: exact mirror of the kernel's bf16-operand / f32-accum math.
    h = x.astype(jnp.bfloat16)
    acc = None
    for (w, b) in params:
        wq = w.astype(jnp.bfloat16).astype(jnp.float32)
        acc = jnp.maximum(
            jnp.dot(h.astype(jnp.float32), wq,
                    preferred_element_type=jnp.float32) + b, 0.0)
        h = acc.astype(jnp.bfloat16)
    ref_bf16 = acc
    assert jnp.allclose(out, ref_bf16, atol=1e-3, rtol=1e-3)

    # Reference 2: pure-f32 forward; loose tolerance covers bf16 operand error.
    ref_f32 = x
    for (w, b) in params:
        ref_f32 = jnp.maximum(ref_f32 @ w + b, 0.0)
    assert jnp.allclose(out, ref_f32, atol=1e-1, rtol=1e-1)

    print("KERNEL_OK")
</pallas_src>

<mosaic_0001>
module attributes {stable_mosaic.version = 11 : i64} {
  func.func @kernel(%arg0: i32, %arg1: memref<8x128xbf16, #tpu.memory_space<vmem>>, %arg2: memref<128x128xbf16, #tpu.memory_space<vmem>>, %arg3: memref<1x128xf32, #tpu.memory_space<vmem>>, %arg4: memref<128x128xbf16, #tpu.memory_space<vmem>>, %arg5: memref<1x128xf32, #tpu.memory_space<vmem>>, %arg6: memref<8x128xf32, #tpu.memory_space<vmem>>) attributes {dimension_semantics = [#tpu.dimension_semantics<parallel>], iteration_bounds = array<i64: 1>, scalar_prefetch = 0 : i64, scratch_operands = 0 : i64, tpu.core_type = #tpu.core_type<tc>, window_params = [{transform_indices = @transform_0, window_bounds = array<i64: 8, 128>}, {pipeline_mode = #tpu.pipeline_mode<synchronous>, transform_indices = @transform_1, window_bounds = array<i64: 128, 128>}, {pipeline_mode = #tpu.pipeline_mode<synchronous>, transform_indices = @transform_2, window_bounds = array<i64: 1, 128>}, {pipeline_mode = #tpu.pipeline_mode<synchronous>, transform_indices = @transform_3, window_bounds = array<i64: 128, 128>}, {pipeline_mode = #tpu.pipeline_mode<synchronous>, transform_indices = @transform_4, window_bounds = array<i64: 1, 128>}, {transform_indices = @transform_5, window_bounds = array<i64: 8, 128>}]} {
    %c0 = arith.constant 0 : index
    %c0_0 = arith.constant 0 : index
    %0 = vector.load %arg1[%c0, %c0_0] : memref<8x128xbf16, #tpu.memory_space<vmem>>, vector<8x128xbf16>
    %c0_1 = arith.constant 0 : index
    %c0_2 = arith.constant 0 : index
    %1 = vector.load %arg2[%c0_1, %c0_2] : memref<128x128xbf16, #tpu.memory_space<vmem>>, vector<128x128xbf16>
    %c0_3 = arith.constant 0 : index
    %c0_4 = arith.constant 0 : index
    %2 = vector.load %arg3[%c0_3, %c0_4] : memref<1x128xf32, #tpu.memory_space<vmem>>, vector<1x128xf32>
    %cst = arith.constant dense<0.000000e+00> : vector<8x128xf32>
    %3 = tpu.matmul %0, %1, %cst {dimension_numbers = #tpu.dot_dimension_numbers<[1], [0], [0], [1], [0, 0, 1, 1], [], []>} : vector<8x128xbf16>, vector<128x128xbf16>, vector<8x128xf32> -> vector<8x128xf32>
    %4 = vector.broadcast %2 : vector<1x128xf32> to vector<8x128xf32>
    %5 = arith.addf %3, %4 : vector<8x128xf32>
    %cst_5 = arith.constant 0.000000e+00 : f32
    %6 = vector.broadcast %cst_5 : f32 to vector<8x128xf32>
    %7 = arith.maximumf %5, %6 : vector<8x128xf32>
    %8 = arith.truncf %7 : vector<8x128xf32> to vector<8x128xbf16>
    %c0_6 = arith.constant 0 : index
    %c0_7 = arith.constant 0 : index
    %9 = vector.load %arg4[%c0_6, %c0_7] : memref<128x128xbf16, #tpu.memory_space<vmem>>, vector<128x128xbf16>
    %c0_8 = arith.constant 0 : index
    %c0_9 = arith.constant 0 : index
    %10 = vector.load %arg5[%c0_8, %c0_9] : memref<1x128xf32, #tpu.memory_space<vmem>>, vector<1x128xf32>
    %cst_10 = arith.constant dense<0.000000e+00> : vector<8x128xf32>
    %11 = tpu.matmul %8, %9, %cst_10 {dimension_numbers = #tpu.dot_dimension_numbers<[1], [0], [0], [1], [0, 0, 1, 1], [], []>} : vector<8x128xbf16>, vector<128x128xbf16>, vector<8x128xf32> -> vector<8x128xf32>
    %12 = vector.broadcast %10 : vector<1x128xf32> to vector<8x128xf32>
    %13 = arith.addf %11, %12 : vector<8x128xf32>
    %cst_11 = arith.constant 0.000000e+00 : f32
    %14 = vector.broadcast %cst_11 : f32 to vector<8x128xf32>
    %15 = arith.maximumf %13, %14 : vector<8x128xf32>
    %c0_12 = arith.constant 0 : index
    %c0_13 = arith.constant 0 : index
    %16 = vector.load %arg6[%c0_12, %c0_13] : memref<8x128xf32, #tpu.memory_space<vmem>>, vector<8x128xf32>
    tpu.vector_store %arg6[%c0_12, %c0_13], %15 {strides = array<i32>} : memref<8x128xf32, #tpu.memory_space<vmem>>, vector<8x128xf32>,
    return
  }
  func.func @transform_0(%arg0: i32) -> (i32, i32) {
    %c0_i32 = arith.constant 0 : i32
    %c0_i32_0 = arith.constant 0 : i32
    return %arg0, %c0_i32 : i32, i32
  }
  func.func @transform_1(%arg0: i32) -> (i32, i32) {
    %c0_i32 = arith.constant 0 : i32
    %c0_i32_0 = arith.constant 0 : i32
    %c0_i32_1 = arith.constant 0 : i32
    return %c0_i32, %c0_i32_0 : i32, i32
  }
  func.func @transform_2(%arg0: i32) -> (i32, i32) {
    %c0_i32 = arith.constant 0 : i32
    %c0_i32_0 = arith.constant 0 : i32
    %c0_i32_1 = arith.constant 0 : i32
    return %c0_i32, %c0_i32_0 : i32, i32
  }
  func.func @transform_3(%arg0: i32) -> (i32, i32) {
    %c0_i32 = arith.constant 0 : i32
    %c0_i32_0 = arith.constant 0 : i32
    %c0_i32_1 = arith.constant 0 : i32
    return %c0_i32, %c0_i32_0 : i32, i32
  }
  func.func @transform_4(%arg0: i32) -> (i32, i32) {
    %c0_i32 = arith.constant 0 : i32
    %c0_i32_0 = arith.constant 0 : i32
    %c0_i32_1 = arith.constant 0 : i32
    return %c0_i32, %c0_i32_0 : i32, i32
  }
  func.func @transform_5(%arg0: i32) -> (i32, i32) {
    %c0_i32 = arith.constant 0 : i32
    %c0_i32_0 = arith.constant 0 : i32
    return %arg0, %c0_i32 : i32, i32
  }
}

</mosaic_0001>

<bundles_post_ra>
// kernel: tpu_custom_call.1
= control target key start
LH: loop header
LB: loop body
LE: loop exit
PB: predicated region body
PF: predicated region fallthrough
CT: control target
= control target key end

     0   :  { %10 = vsyncpa [#allocation3], 0  ;;  %s596_s0 = inlined_call_operand.hbm [shape: bf16[8,128], index: 0, kind: input, shape index: {}]   ;;  %s597_s1 = inlined_call_operand.hbm [shape: bf16[128,128], index: 1, kind: input, shape index: {}]   ;;  %s598_s2 = inlined_call_operand.vmem [shape: f32[1,128], index: 2, kind: input, shape index: {}]   ;;  %s599_s3 = inlined_call_operand.hbm [shape: bf16[128,128], index: 3, kind: input, shape index: {}]   ;;  %s600_s4 = inlined_call_operand.vmem [shape: f32[1,128], index: 4, kind: input, shape index: {}]   ;;  %s601_s5 = inlined_call_operand.hbm [shape: f32[8,128], index: 5, kind: output, shape index: {}]  }
   0x1   :  { %11 = vsyncpa [#allocation6], 0 }
   0x2   :  { %12 = vsyncpa [#allocation4], 0  ;;  %s498_s18 = smov [#allocation5]   ;;  %s404_s22 = scalar_lea.hbm %s597_s1, 1024 }
   0x3   :  { %s28_s19 = sshll.u32 %s498_s18, 4  ;;  %p405_p0 = scmp.ne.s32.totalorder %s597_s1, %s404_s22  ;;  %s29_s19 = int_to_ptr.vmem [resolvable:$true] %s28_s19 }
   0x4   :  { %p408_p1 = scmp.lt.u32.totalorder %s404_s22, %s597_s1 }
   0x6   :  { %p410_p2 = pnand %p408_p1, %p405_p0 }
   0x8   :  { %413 = shalt.err (!%p410_p2)
}
   0x9   :  { %s414_s27 = scalar_lea.vmem %s29_s19, 1024  ;;  %p419_p4 = scmp.lt.s32.totalorder %s29_s19, %s29_s19 }
   0xa   :  { %p415_p3 = scmp.ne.s32.totalorder %s29_s19, %s414_s27  ;;  %p420_p5 = scmp.lt.s32.totalorder %s414_s27, %s414_s27 }
   0xc   :  { %p421_p6 = por %p420_p5, %p419_p4 }
   0xe   :  { %p422_p7 = pnand %p421_p6, %p415_p3 }
  0x10   :  { %425 = shalt.err (!%p422_p7)
}
  0x11   :  { %s499_s28 = smov 64   ;;  %s500_s29 = smov 4  }
  0x12   :  { %34 = dma.hbm_to_vmem [thread:$0]  %s597_s1, 1024, %s29_s19, [#allocation6], %s499_s28, %s499_s28, %s500_s29  }
  0x13   :  { %s501_s7 = smov [#allocation2]   ;;  %s502_s9 = smov [#allocation7]  }
  0x14   :  { %s19_s8 = sshll.u32 %s501_s7, 4  ;;  %s42_s10 = sshll.u32 %s502_s9, 4  ;;  %s20_s8 = int_to_ptr.vmem [resolvable:$true] %s19_s8  ;;  %s43_s10 = int_to_ptr.vmem [resolvable:$true] %s42_s10 }
  0x15   :  { %s426_s13 = scalar_lea.hbm %s596_s0, 64 }
  0x16   :  { %p427_p8 = scmp.ne.s32.totalorder %s596_s0, %s426_s13  ;;  %p430_p9 = scmp.lt.u32.totalorder %s426_s13, %s596_s0 }
  0x18   :  { %p432_p10 = pnand %p430_p9, %p427_p8 }
  0x1a   :  { %435 = shalt.err (!%p432_p10)
}
  0x1b   :  { %s436_s1 = scalar_lea.vmem %s20_s8, 64  ;;  %p441_p12 = scmp.lt.s32.totalorder %s20_s8, %s20_s8 }
  0x1c   :  { %p437_p11 = scmp.ne.s32.totalorder %s20_s8, %s436_s1  ;;  %p442_p13 = scmp.lt.s32.totalorder %s436_s1, %s436_s1 }
  0x1e   :  { %p443_p0 = por %p442_p13, %p441_p12 }
  0x20   :  { %p444_p1 = pnand %p443_p0, %p437_p11 }
  0x22   :  { %447 = shalt.err (!%p444_p1)
}
  0x23   :  { %22 = dma.hbm_to_vmem [thread:$0]  %s596_s0, 64, %s20_s8, [#allocation3]  }
  0x24   :  { %s448_s22 = scalar_lea.hbm %s599_s3, 1024 }
  0x25   :  { %p449_p2 = scmp.ne.s32.totalorder %s599_s3, %s448_s22  ;;  %p452_p3 = scmp.lt.u32.totalorder %s448_s22, %s599_s3 }
  0x27   :  { %p454_p4 = pnand %p452_p3, %p449_p2 }
  0x29   :  { %457 = shalt.err (!%p454_p4)
}
  0x2a   :  { %s458_s27 = scalar_lea.vmem %s43_s10, 1024  ;;  %p463_p6 = scmp.lt.s32.totalorder %s43_s10, %s43_s10 }
  0x2b   :  { %p459_p5 = scmp.ne.s32.totalorder %s43_s10, %s458_s27  ;;  %p464_p7 = scmp.lt.s32.totalorder %s458_s27, %s458_s27 }
  0x2d   :  { %p465_p8 = por %p464_p7, %p463_p6 }
  0x2f   :  { %p466_p9 = pnand %p465_p8, %p459_p5 }
  0x31   :  { %469 = shalt.err (!%p466_p9)
}
  0x32   :  { %48 = dma.hbm_to_vmem [thread:$0]  %s599_s3, 1024, %s43_s10, [#allocation6], %s499_s28, %s499_s28, %s500_s29  }
  0x33   :  { %492 = dma.done.wait [#allocation3], 64  }
  0x34   :  { %493 = vsyncadd [#allocation3], 4294967232 }
  0x35   :  { %494 = dma.done.wait [#allocation6], 2048  }
  0x36   :  { %495 = vsyncadd [#allocation6], 4294965248  ;;  %v503_v0 = vmov 0.0   ;;  %vm504_vm0 = vmmov 0   ;;  %v388_v1 = vld [vmem:[#allocation5] sm:$0xff]   ;;  %v389_v2 = vld [vmem:[#allocation5 + $0x8] sm:$0xff]  }
  0x37   :  { %340 = vmatprep.subr.bf16.mxu0 %v503_v0  ;;  %356 = vmatprep.mubr.msk.bf16.mxu0 %vm504_vm0, %v503_v0  ;;  %v390_v3 = vld [vmem:[#allocation5 + $0x10] sm:$0xff]   ;;  %v396_v4 = vld [vmem:[#allocation7] sm:$0xff]   ;;  %v391_v5 = vld [vmem:[#allocation5 + $0x18] sm:$0xff]   ;;  %s505_s7 = smov [#allocation8]  }
  0x38   :  { %360 = vmatprep.subr.bf16.mxu1 %v503_v0  ;;  %376 = vmatprep.mubr.msk.bf16.mxu1 %vm504_vm0, %v503_v0  ;;  %v397_v6 = vld [vmem:[#allocation7 + $0x8] sm:$0xff]   ;;  %v392_v7 = vld [vmem:[#allocation5 + $0x20] sm:$0xff]   ;;  %v398_v8 = vld [vmem:[#allocation7 + $0x10] sm:$0xff]   ;;  %s294_s8 = sshll.u32 %s505_s7, 4  ;;  %s295_s8 = int_to_ptr.vmem [resolvable:$true] %s294_s8 }
  0x39   :  { %341 = vmatpush3.bf16.msra.mxu0 %v388_v1  ;;  %361 = vmatpush3.bf16.msra.mxu1 %v396_v4  ;;  %v393_v9 = vld [vmem:[#allocation5 + $0x28] sm:$0xff]   ;;  %v399_v10 = vld [vmem:[#allocation7 + $0x18] sm:$0xff]   ;;  %v394_v11 = vld [vmem:[#allocation5 + $0x30] sm:$0xff]   ;;  %p475_p11 = scmp.lt.s32.totalorder %s295_s8, %s295_s8 }
  0x3a   :  { %342 = vmatprep.subr.bf16.mxu0 %v503_v0  ;;  %362 = vmatprep.subr.bf16.mxu1 %v503_v0  ;;  %v400_v12 = vld [vmem:[#allocation7 + $0x20] sm:$0xff]   ;;  %v395_v13 = vld [vmem:[#allocation5 + $0x38] sm:$0xff]   ;;  %v401_v14 = vld [vmem:[#allocation7 + $0x28] sm:$0xff]  }
  0x3b   :  { %v61_v15 = vld [vmem:[#allocation2] sm:$0xf]  ;;  %v402_v16 = vld [vmem:[#allocation7 + $0x30] sm:$0xff]  }
  0x3c   :  { %v403_v17 = vld [vmem:[#allocation7 + $0x38] sm:$0xff]  }
  0x3d   :  { %343 = vmatpush3.bf16.msra.mxu0 %v389_v2  ;;  %363 = vmatpush3.bf16.msra.mxu1 %v397_v6  ;;  %v304_v18 = vld [vmem:[%s598_s2] ss:$0 sm:$0xff]  ;;  %s470_s2 = scalar_lea.vmem %s295_s8, 128 }
  0x3e   :  { %344 = vmatprep.subr.bf16.mxu0 %v503_v0  ;;  %364 = vmatprep.subr.bf16.mxu1 %v503_v0  ;;  %v313_v26 = vld [vmem:[%s600_s4] ss:$0 sm:$0xff]  ;;  %p471_p10 = scmp.ne.s32.totalorder %s295_s8, %s470_s2  ;;  %p476_p12 = scmp.lt.s32.totalorder %s470_s2, %s470_s2 }
  0x40   :  { %p477_p13 = por %p476_p12, %p475_p11 }
  0x41   :  { %345 = vmatpush3.bf16.msra.mxu0 %v390_v3  ;;  %365 = vmatpush3.bf16.msra.mxu1 %v398_v8 }
  0x42   :  { %346 = vmatprep.subr.bf16.mxu0 %v503_v0  ;;  %366 = vmatprep.subr.bf16.mxu1 %v503_v0  ;;  %p478_p0 = pnand %p477_p13, %p471_p10 }
  0x45   :  { %347 = vmatpush3.bf16.msra.mxu0 %v391_v5  ;;  %367 = vmatpush3.bf16.msra.mxu1 %v399_v10 }
  0x46   :  { %348 = vmatprep.subr.bf16.mxu0 %v503_v0  ;;  %368 = vmatprep.subr.bf16.mxu1 %v503_v0 }
  0x49   :  { %349 = vmatpush3.bf16.msra.mxu0 %v392_v7  ;;  %369 = vmatpush3.bf16.msra.mxu1 %v400_v12 }
  0x4a   :  { %350 = vmatprep.subr.bf16.mxu0 %v503_v0  ;;  %370 = vmatprep.subr.bf16.mxu1 %v503_v0 }
  0x4d   :  { %351 = vmatpush3.bf16.msra.mxu0 %v393_v9  ;;  %371 = vmatpush3.bf16.msra.mxu1 %v401_v14 }
  0x4e   :  { %352 = vmatprep.subr.bf16.mxu0 %v503_v0  ;;  %372 = vmatprep.subr.bf16.mxu1 %v503_v0 }
  0x51   :  { %353 = vmatpush3.bf16.msra.mxu0 %v394_v11  ;;  %373 = vmatpush3.bf16.msra.mxu1 %v402_v16 }
  0x52   :  { %354 = vmatprep.subr.bf16.mxu0 %v503_v0  ;;  %374 = vmatprep.subr.bf16.mxu1 %v503_v0 }
  0x55   :  { %355 = vmatpush3.bf16.msra.mxu0 %v395_v13  ;;  %375 = vmatpush3.bf16.msra.mxu1 %v403_v17 }
  0x58   :  { %357 = vmatmul.mubr.bf16.vlgmr.msra.gmra.mrb[0].mxu0 %v61_v15 }
 0x12b   :  { %v167_v19 = vpop.f32.mrb[0].mxu0 }
 0x12c   :  { %v168_v20 = vadd.f32 %v304_v18, %v167_v19  ;;  %v358_v21 = vpop.f32.mrb[1].mxu0 }
 0x12d   :  { %v170_v22 = vpop.f32.mrb[2].mxu0 }
 0x12e   :  { %v173_v23 = vmax.f32 %v168_v20, 0.0  ;;  %v359_v24 = vpop.f32.mrb[3].mxu0 }
 0x130   :  { %v174_v25 = vpack.c.bf16 %v173_v23, %v173_v23 }
 0x132   :  { %377 = vmatmul.mubr.bf16.vlgmr.msra.gmra.mrb[0].mxu1 %v174_v25 }
 0x205   :  { %v280_v27 = vpop.f32.mrb[0].mxu1 }
 0x206   :  { %v281_v28 = vadd.f32 %v313_v26, %v280_v27  ;;  %v378_v29 = vpop.f32.mrb[1].mxu1 }
 0x207   :  { %v283_v30 = vpop.f32.mrb[2].mxu1 }
 0x208   :  { %v286_v31 = vmax.f32 %v281_v28, 0.0  ;;  %v379_v32 = vpop.f32.mrb[3].mxu1 }
 0x20a   :  { %287 = vst [vmem:[#allocation8] sm:$0xff] %v286_v31 }
 0x20b   :  { %481 = shalt.err (!%p478_p0)
}
 0x20c   :  { %s482_s4 = scalar_lea.hbm %s601_s5, 128 }
 0x20d   :  { %p483_p1 = scmp.ne.s32.totalorder %s601_s5, %s482_s4  ;;  %p486_p2 = scmp.lt.u32.totalorder %s482_s4, %s601_s5 }
 0x20f   :  { %p488_p3 = pnand %p486_p2, %p483_p1 }
 0x211   :  { %491 = shalt.err (!%p488_p3)
}
 0x212   :  { %297 = dma.vmem_to_hbm [thread:$0]  %s295_s8, 128, %s601_s5, [#allocation4]  }
 0x213   :  { %496 = dma.done.wait [#allocation4], 128  }
 0x214   :  { %497 = vsyncadd [#allocation4], 4294967168 }
 0x215   :  { %301 = vsyncpa [#allocation3], 1 }
 0x216   :  { %302 = vsyncpa [#allocation6], 1 }
 0x217   :  { %303 = vsyncpa [#allocation4], 1 }

</bundles_post_ra>
